<compile_context>
chip_gen: v7x
topology: tpu7x:2x2x1
jax: 0.10.0
libtpu: 0.0.40
codegen_flags: <defaults>
</compile_context>

<pallas_src>
import functools

import jax
import jax.numpy as jnp
from jax.experimental import pallas as pl
from jax.experimental.pallas import tpu as pltpu


def _kernel_single_k(x_ref, w_ref, b_ref, o_ref, *, tn, tk, col_align):
    """K fits in one step: out = x @ W + b + x, residual taken from the lhs tile."""
    if tn == tk:
        xres = x_ref[...]
    else:
        col = pl.multiple_of(pl.program_id(1) * tn, col_align)
        xres = x_ref[:, pl.ds(col, tn)]
    acc = jnp.dot(x_ref[...], w_ref[...], preferred_element_type=jnp.float32)
    o_ref[...] = (acc + xres.astype(jnp.float32)
                  + b_ref[...].astype(jnp.float32)).astype(o_ref.dtype)


def _kernel_acc_in_out(x_ref, w_ref, b_ref, xres_ref, o_ref):
    """Multi-K, f32 output: accumulate directly into the resident output block."""
    k = pl.program_id(2)

    @pl.when(k == 0)
    def _init():
        o_ref[...] = (xres_ref[...].astype(jnp.float32)
                      + b_ref[...].astype(jnp.float32))

    o_ref[...] += jnp.dot(x_ref[...], w_ref[...],
                          preferred_element_type=jnp.float32)


def _kernel_acc_in_scratch(x_ref, w_ref, b_ref, xres_ref, o_ref, acc_ref):
    """Multi-K, non-f32 output: f32 scratch accumulator, cast once at the end."""
    k = pl.program_id(2)

    @pl.when(k == 0)
    def _init():
        acc_ref[...] = (xres_ref[...].astype(jnp.float32)
                        + b_ref[...].astype(jnp.float32))

    acc_ref[...] += jnp.dot(x_ref[...], w_ref[...],
                            preferred_element_type=jnp.float32)

    @pl.when(k == pl.num_programs(2) - 1)
    def _finalize():
        o_ref[...] = acc_ref[...].astype(o_ref.dtype)


def _pick_feature_tile(dim, want):
    """Largest lane-aligned (multiple-of-128) divisor of `dim` <= want, else full extent."""
    if dim <= want:
        return dim
    t = (want // 128) * 128
    while t >= 128:
        if dim % t == 0:
            return t
        t -= 128
    return dim


def resnet_forward(x, w, b, *, tile_m=512, tile_n=512, tile_k=512,
                   compute_dtype=None):
    """Fused residual Linear block: out = x @ W + b + x."""
    out_dtype = x.dtype
    if compute_dtype is not None:
        x = x.astype(compute_dtype)
        w = w.astype(compute_dtype)

    batch, h_in = x.shape
    h_in2, h_out = w.shape
    assert h_in == h_in2 and h_in == h_out, "residual requires hidden_in == hidden_out"
    assert b.size == h_out
    b = b.reshape(1, h_out)

    # Tile selection: big M tiles to avoid re-streaming W; lane-aligned divisors on N/K.
    tm = min(tile_m, batch)
    if tm < batch:
        tm = max(8, (tm // 8) * 8)
    tn = _pick_feature_tile(h_out, tile_n)
    tk = _pick_feature_tile(h_in, tile_k)

    m_grid = pl.cdiv(batch, tm)
    n_grid = h_out // tn
    k_grid = h_in // tk

    # v7x has 2 TensorCores sharded over "parallel" grid axes: keep >= 2 parallel
    # steps when the feature dim allows it (harmless on the 1-TC v5e/v6e).
    if m_grid * n_grid < 2 and tn % 256 == 0:
        tn //= 2
        n_grid = h_out // tn

    single_k = (k_grid == 1)
    f32_out = (out_dtype == jnp.float32)

    if single_k:
        grid = (m_grid, n_grid)
        kernel = functools.partial(
            _kernel_single_k, tn=tn, tk=tk,
            col_align=128 if tn % 128 == 0 else tn)
        in_specs = [
            pl.BlockSpec((tm, tk), lambda i, j: (i, 0)),   # x (lhs; also carries residual cols)
            pl.BlockSpec((tk, tn), lambda i, j: (0, j)),   # W
            pl.BlockSpec((1, tn), lambda i, j: (0, j)),    # bias row
        ]
        out_specs = pl.BlockSpec((tm, tn), lambda i, j: (i, j))
        scratch = []
        operands = (x, w, b)
        semantics = ("parallel", "parallel")
        res_bytes = 0
        acc_bytes = 0
    else:
        grid = (m_grid, n_grid, k_grid)
        in_specs = [
            pl.BlockSpec((tm, tk), lambda i, j, k: (i, k)),   # x (matmul lhs)
            pl.BlockSpec((tk, tn), lambda i, j, k: (k, j)),   # W
            pl.BlockSpec((1, tn), lambda i, j, k: (0, j)),    # bias row
            pl.BlockSpec((tm, tn), lambda i, j, k: (i, j)),   # x (residual)
        ]
        out_specs = pl.BlockSpec((tm, tn), lambda i, j, k: (i, j))
        operands = (x, w, b, x)
        semantics = ("parallel", "parallel", "arbitrary")
        res_bytes = tm * tn * x.dtype.itemsize
        if f32_out:
            kernel = _kernel_acc_in_out     # accumulate straight into o_ref
            scratch = []
            acc_bytes = 0
        else:
            kernel = _kernel_acc_in_scratch
            scratch = [pltpu.VMEM((tm, tn), jnp.float32)]
            acc_bytes = tm * tn * 4

    # Generation-aware VMEM budget: real double-buffered footprint * 1.25,
    # capped below the physical VMEM of the chip we are actually running on.
    out_itemsize = jnp.dtype(out_dtype).itemsize
    in_bytes = (tm * tk * x.dtype.itemsize
                + tk * tn * w.dtype.itemsize
                + tn * b.dtype.itemsize
                + res_bytes)
    needed = 2 * (in_bytes + tm * tn * out_itemsize) + acc_bytes
    try:
        cap = int(getattr(pltpu.get_tpu_info(), "vmem_capacity_bytes", 64 << 20))
    except Exception:
        cap = 64 << 20   # conservative fallback: v7x physical VMEM
    vmem_limit = int(min(max(int(1.25 * needed), 16 << 20), cap - (8 << 20)))

    return pl.pallas_call(
        kernel,
        out_shape=jax.ShapeDtypeStruct((batch, h_out), out_dtype),
        grid=grid,
        in_specs=in_specs,
        out_specs=out_specs,
        scratch_shapes=scratch,
        compiler_params=pltpu.CompilerParams(
            dimension_semantics=semantics,
            vmem_limit_bytes=vmem_limit,
        ),
    )(*operands)


if __name__ == "__main__":
    key = jax.random.PRNGKey(0)

    def make(batch, hidden, dtype):
        kk = jax.random.fold_in(key, batch * 1009 + hidden)
        kx, kw, kb = jax.random.split(kk, 3)
        x = jax.random.normal(kx, (batch, hidden), dtype=jnp.float32).astype(dtype)
        w = (jax.random.normal(kw, (hidden, hidden), dtype=jnp.float32) * 0.05).astype(dtype)
        b = (jax.random.normal(kb, (1, hidden), dtype=jnp.float32) * 0.05).astype(dtype)
        return x, w, b

    # 1) Small, full-extent blocks (single-K fast path, residual == lhs tile).
    x, w, b = make(8, 32, jnp.float32)
    out = resnet_forward(x, w, b)
    jax.block_until_ready(out)
    ref = x @ w + b + x
    assert out.shape == x.shape and out.dtype == x.dtype
    assert jnp.allclose(out, ref, atol=5e-3, rtol=5e-3), float(jnp.max(jnp.abs(out - ref)))

    # 2) Single-K with N split for megacore: residual sliced from the resident lhs tile.
    x, w, b = make(128, 256, jnp.float32)
    out = resnet_forward(x, w, b)
    jax.block_until_ready(out)
    ref = x @ w + b + x
    assert jnp.allclose(out, ref, atol=5e-3, rtol=5e-3), float(jnp.max(jnp.abs(out - ref)))

    # 3) Tiled multi-K, f32: accumulate directly into the resident output block.
    x, w, b = make(256, 256, jnp.float32)
    out = resnet_forward(x, w, b, tile_m=128, tile_n=128, tile_k=128)
    jax.block_until_ready(out)
    ref = x @ w + b + x
    assert jnp.allclose(out, ref, atol=5e-3, rtol=5e-3), float(jnp.max(jnp.abs(out - ref)))

    # 4) bf16 compute (halved HBM bytes) + ragged batch (masked edge block, no host pad).
    x, w, b = make(200, 256, jnp.float32)
    out = resnet_forward(x, w, b, tile_m=128, tile_n=128, tile_k=128,
                         compute_dtype=jnp.bfloat16)
    jax.block_until_ready(out)
    x16 = x.astype(jnp.bfloat16).astype(jnp.float32)
    w16 = w.astype(jnp.bfloat16).astype(jnp.float32)
    ref = x16 @ w16 + b + x16
    assert out.shape == x.shape and out.dtype == x.dtype
    assert jnp.allclose(out, ref, atol=2e-2, rtol=2e-2), float(jnp.max(jnp.abs(out - ref)))

    # 5) bf16 end-to-end (non-f32 output -> f32 scratch accumulator path).
    x, w, b = make(128, 256, jnp.bfloat16)
    out = resnet_forward(x, w, b, tile_k=128)
    jax.block_until_ready(out)
    xf = x.astype(jnp.float32)
    ref = xf @ w.astype(jnp.float32) + b.astype(jnp.float32) + xf
    assert out.dtype == jnp.bfloat16
    err = jnp.max(jnp.abs(out.astype(jnp.float32) - ref))
    assert jnp.allclose(out.astype(jnp.float32), ref, atol=5e-2, rtol=5e-2), float(err)

    print("KERNEL_OK")
</pallas_src>

<mosaic_0001>
module attributes {stable_mosaic.version = 11 : i64} {
  func.func @_kernel_single_k(%arg0: i32, %arg1: i32, %arg2: memref<8x32xf32, #tpu.memory_space<vmem>>, %arg3: memref<32x32xf32, #tpu.memory_space<vmem>>, %arg4: memref<1x32xf32, #tpu.memory_space<vmem>>, %arg5: memref<8x32xf32, #tpu.memory_space<vmem>>) attributes {dimension_semantics = [#tpu.dimension_semantics<parallel>, #tpu.dimension_semantics<parallel>], iteration_bounds = array<i64: 1, 1>, scalar_prefetch = 0 : i64, scratch_operands = 0 : i64, tpu.core_type = #tpu.core_type<tc>, window_params = [{transform_indices = @transform_0, window_bounds = array<i64: 8, 32>}, {transform_indices = @transform_1, window_bounds = array<i64: 32, 32>}, {transform_indices = @transform_2, window_bounds = array<i64: 1, 32>}, {transform_indices = @transform_3, window_bounds = array<i64: 8, 32>}]} {
    %c0 = arith.constant 0 : index
    %c0_0 = arith.constant 0 : index
    %0 = vector.load %arg2[%c0, %c0_0] : memref<8x32xf32, #tpu.memory_space<vmem>>, vector<8x32xf32>
    %c0_1 = arith.constant 0 : index
    %c0_2 = arith.constant 0 : index
    %1 = vector.load %arg2[%c0_1, %c0_2] : memref<8x32xf32, #tpu.memory_space<vmem>>, vector<8x32xf32>
    %c0_3 = arith.constant 0 : index
    %c0_4 = arith.constant 0 : index
    %2 = vector.load %arg3[%c0_3, %c0_4] : memref<32x32xf32, #tpu.memory_space<vmem>>, vector<32x32xf32>
    %cst = arith.constant dense<0.000000e+00> : vector<8x32xf32>
    %3 = tpu.matmul %1, %2, %cst {dimension_numbers = #tpu.dot_dimension_numbers<[1], [0], [0], [1], [0, 0, 1, 1], [], []>} : vector<8x32xf32>, vector<32x32xf32>, vector<8x32xf32> -> vector<8x32xf32>
    %4 = arith.addf %3, %0 : vector<8x32xf32>
    %c0_5 = arith.constant 0 : index
    %c0_6 = arith.constant 0 : index
    %5 = vector.load %arg4[%c0_5, %c0_6] : memref<1x32xf32, #tpu.memory_space<vmem>>, vector<1x32xf32>
    %6 = vector.broadcast %5 : vector<1x32xf32> to vector<8x32xf32>
    %7 = arith.addf %4, %6 : vector<8x32xf32>
    %c0_7 = arith.constant 0 : index
    %c0_8 = arith.constant 0 : index
    %8 = vector.load %arg5[%c0_7, %c0_8] : memref<8x32xf32, #tpu.memory_space<vmem>>, vector<8x32xf32>
    tpu.vector_store %arg5[%c0_7, %c0_8], %7 {strides = array<i32>} : memref<8x32xf32, #tpu.memory_space<vmem>>, vector<8x32xf32>,
    return
  }
  func.func @transform_0(%arg0: i32, %arg1: i32) -> (i32, i32) {
    %c0_i32 = arith.constant 0 : i32
    %c0_i32_0 = arith.constant 0 : i32
    return %arg0, %c0_i32 : i32, i32
  }
  func.func @transform_1(%arg0: i32, %arg1: i32) -> (i32, i32) {
    %c0_i32 = arith.constant 0 : i32
    %c0_i32_0 = arith.constant 0 : i32
    return %c0_i32, %arg1 : i32, i32
  }
  func.func @transform_2(%arg0: i32, %arg1: i32) -> (i32, i32) {
    %c0_i32 = arith.constant 0 : i32
    %c0_i32_0 = arith.constant 0 : i32
    return %c0_i32, %arg1 : i32, i32
  }
  func.func @transform_3(%arg0: i32, %arg1: i32) -> (i32, i32) {
    %c0_i32 = arith.constant 0 : i32
    return %arg0, %arg1 : i32, i32
  }
}

</mosaic_0001>

<bundles_post_ra>
// kernel: tpu_custom_call.1
= control target key start
LH: loop header
LB: loop body
LE: loop exit
PB: predicated region body
PF: predicated region fallthrough
CT: control target
= control target key end

     0   :  { %8 = vsyncpa [#allocation3], 0  ;;  %s323_s0 = inlined_call_operand.hbm [shape: f32[8,32], index: 0, kind: input, shape index: {}]   ;;  %s324_s1 = inlined_call_operand.hbm [shape: f32[32,32], index: 1, kind: input, shape index: {}]   ;;  %s325_s2 = inlined_call_operand.vmem [shape: f32[1,32], index: 2, kind: input, shape index: {}]   ;;  %s326_s3 = inlined_call_operand.hbm [shape: f32[8,32], index: 3, kind: output, shape index: {}]  }
   0x1   :  { %9 = vsyncpa [#allocation6], 0 }
   0x2   :  { %10 = vsyncpa [#allocation4], 0  ;;  %s249_s12 = smov [#allocation2]   ;;  %s250_s14 = smov [#allocation5]  }
   0x3   :  { %s17_s13 = sshll.u32 %s249_s12, 4  ;;  %s26_s15 = sshll.u32 %s250_s14, 4  ;;  %s18_s13 = int_to_ptr.vmem [resolvable:$true] %s17_s13  ;;  %s277_s15 = int_to_ptr.vmem [resolvable:$true] %s26_s15 }
   0x4   :  { %s177_s18 = scalar_lea.hbm %s323_s0, 128 }
   0x5   :  { %p178_p0 = scmp.ne.s32.totalorder %s323_s0, %s177_s18  ;;  %p181_p1 = scmp.lt.u32.totalorder %s177_s18, %s323_s0 }
   0x7   :  { %p183_p2 = pnand %p181_p1, %p178_p0 }
   0x9   :  { %186 = shalt.err (!%p183_p2)
}
   0xa   :  { %s187_s23 = scalar_lea.vmem %s18_s13, 128  ;;  %p192_p4 = scmp.lt.s32.totalorder %s18_s13, %s18_s13 }
   0xb   :  { %p188_p3 = scmp.ne.s32.totalorder %s18_s13, %s187_s23  ;;  %p193_p5 = scmp.lt.s32.totalorder %s187_s23, %s187_s23 }
   0xd   :  { %p194_p6 = por %p193_p5, %p192_p4 }
   0xf   :  { %p195_p7 = pnand %p194_p6, %p188_p3 }
  0x11   :  { %198 = shalt.err (!%p195_p7)
}
  0x12   :  { %20 = dma.hbm_to_vmem [thread:$0]  %s323_s0, 128, %s18_s13, [#allocation3]  }
  0x13   :  { %s199_s28 = scalar_lea.hbm %s324_s1, 512 }
  0x14   :  { %p200_p8 = scmp.ne.s32.totalorder %s324_s1, %s199_s28  ;;  %p203_p9 = scmp.lt.u32.totalorder %s199_s28, %s324_s1 }
  0x16   :  { %p205_p10 = pnand %p203_p9, %p200_p8 }
  0x18   :  { %208 = shalt.err (!%p205_p10)
}
  0x19   :  { %s209_s6 = scalar_lea.vmem %s277_s15, 512  ;;  %p214_p12 = scmp.lt.s32.totalorder %s277_s15, %s277_s15 }
  0x1a   :  { %p210_p11 = scmp.ne.s32.totalorder %s277_s15, %s209_s6  ;;  %p215_p13 = scmp.lt.s32.totalorder %s209_s6, %s209_s6 }
  0x1c   :  { %p216_p0 = por %p215_p13, %p214_p12 }
  0x1e   :  { %p217_p1 = pnand %p216_p0, %p210_p11 }
  0x20   :  { %220 = shalt.err (!%p217_p1)
}
  0x21   :  { %s251_s0 = smov 128   ;;  %s252_s7 = smov 8  }
  0x22   :  { %32 = dma.hbm_to_vmem [thread:$0]  %s324_s1, 512, %s277_s15, [#allocation6], %s251_s0, %s251_s0, %s252_s7  }
  0x23   :  { %243 = dma.done.wait [#allocation3], 128  }
  0x24   :  { %244 = vsyncadd [#allocation3], 4294967168 }
  0x25   :  { %245 = dma.done.wait [#allocation6], 512  }
  0x26   :  { %246 = vsyncadd [#allocation6], 4294966784  ;;  %v253_v0 = vmov 0.0|0.0   ;;  %vm254_vm0 = vmmov 0   ;;  %v255_v1 = vmov 0.0   ;;  %v42_v2 = vld [vmem:[#allocation5] sm:$0xff] }
  0x27   :  { %163 = vmatprep.subr.bf16.mxu0 %v253_v0  ;;  %160 = vmatprep.mubr.msk.f32.mxu0 %vm254_vm0, %v255_v1  ;;  %v43_v3 = vld [vmem:[#allocation5 + $0x8] sm:$0xff]  ;;  %v44_v4 = vld [vmem:[#allocation5 + $0x10] sm:$0xff]  ;;  %v45_v6 = vld [vmem:[#allocation5 + $0x18] sm:$0xff]  ;;  %vm46_vm1 = vcmask 261120   ;;  %s256_s11 = smov [#allocation7]  }
  0x28   :  { %v164_v5 = vpack.c.bf16 %v43_v3, %v42_v2  ;;  %v167_v7 = vpack.c.bf16 %v45_v6, %v44_v4  ;;  %v41_v8 = vld [vmem:[#allocation2] sm:$0xff]  ;;  %s135_s12 = sshll.u32 %s256_s11, 4  ;;  %s136_s12 = int_to_ptr.vmem [resolvable:$true] %s135_s12 }
  0x29   :  { %v146_v10 = vld [vmem:[%s325_s2] ss:$0 sm:$0xff]  ;;  %s221_s13 = scalar_lea.vmem %s136_s12, 128  ;;  %p226_p3 = scmp.lt.s32.totalorder %s136_s12, %s136_s12 }
  0x2a   :  { %165 = vmatpush3.bf16.msra.mxu0 %v164_v5  ;;  %p222_p2 = scmp.ne.s32.totalorder %s136_s12, %s221_s13  ;;  %p227_p4 = scmp.lt.s32.totalorder %s221_s13, %s221_s13 }
  0x2b   :  { %166 = vmatprep.subr.bf16.mxu0 %v253_v0 }
  0x2c   :  { %p228_p5 = por %p227_p4, %p226_p3 }
  0x2e   :  { %168 = vmatpush3.bf16.msra.mxu0 %v167_v7  ;;  %p229_p6 = pnand %p228_p5, %p222_p2 }
  0x31   :  { %161 = vmatmul.mubr.msk.f32.vlgmr.msra.gmra.mrb[0].mxu0 %vm46_vm1, %v41_v8 }
 0x104   :  { %v116_v9 = vpop.f32.mrb[0].mxu0 }
 0x105   :  { %v117_v11 = vadd.f32 %v116_v9, %v41_v8  ;;  %v162_v12 = vpop.f32.mrb[1].mxu0 }
 0x107   :  { %v127_v13 = vadd.f32 %v146_v10, %v117_v11 }
 0x109   :  { %128 = vst.msk [vmem:[#allocation7] sm:$0xff] %vm46_vm1, %v127_v13 }
 0x10a   :  { %232 = shalt.err (!%p229_p6)
}
 0x10b   :  { %s233_s16 = scalar_lea.hbm %s326_s3, 128 }
 0x10c   :  { %p234_p7 = scmp.ne.s32.totalorder %s326_s3, %s233_s16  ;;  %p237_p8 = scmp.lt.u32.totalorder %s233_s16, %s326_s3 }
 0x10e   :  { %p239_p9 = pnand %p237_p8, %p234_p7 }
 0x110   :  { %242 = shalt.err (!%p239_p9)
}
 0x111   :  { %138 = dma.vmem_to_hbm [thread:$0]  %s136_s12, 128, %s326_s3, [#allocation4]  }
 0x112   :  { %247 = dma.done.wait [#allocation4], 128  }
 0x113   :  { %248 = vsyncadd [#allocation4], 4294967168 }
 0x114   :  { %142 = vsyncpa [#allocation3], 1 }
 0x115   :  { %143 = vsyncpa [#allocation6], 1 }
 0x116   :  { %144 = vsyncpa [#allocation4], 1 }

</bundles_post_ra>
